<compile_context>
chip_gen: v5e
topology: v5e:2x2
jax: 0.10.0
libtpu: 0.0.40
codegen_flags: <defaults>
</compile_context>

<pallas_src>
import functools
import math

import jax
import jax.numpy as jnp
from jax import lax
from jax.experimental import pallas as pl
from jax.experimental.pallas import tpu as pltpu


def _causal_conv1d_kernel(*refs, K, dilation, P, TL, L,
                          use_carry, use_next, left_zeros, right_zeros,
                          mask_tail, use_im2col):
    # refs: x_cur, [x_halo], w2, bias, out, carry_scratch
    if use_next:
        x_ref, xh_ref, w_ref, b_ref, o_ref, carry_ref = refs
    else:
        x_ref, w_ref, b_ref, o_ref, carry_ref = refs
        xh_ref = None

    i = pl.program_id(1)
    c_in = x_ref.shape[1]
    in_dt = x_ref.dtype
    cdt = w_ref.dtype

    if use_carry:
        @pl.when(i == 0)
        def _zero_carry():
            carry_ref[...] = jnp.zeros_like(carry_ref)

    x_cur = x_ref[0]                                    # (C_in, TLX)

    # body = [current tile | right halo (or zeros)]; column c sits at global
    # position i*TL + c.
    body_parts = [x_cur]
    if use_next:
        body_parts.append(xh_ref[0])                    # (C_in, HALO) — small
    elif right_zeros > 0:
        body_parts.append(jnp.zeros((c_in, right_zeros), in_dt))
    body = body_parts[0] if len(body_parts) == 1 else jnp.concatenate(
        body_parts, axis=1)

    if mask_tail:
        # Only when rh > 0 AND P > 0 can a valid output read a position >= L
        # (conv right padding / ragged-tile or clamped-halo garbage).  The
        # left side never needs a mask: it is real data or the zeroed carry.
        pos = lax.broadcasted_iota(jnp.int32, body.shape, 1) + i * TL
        body = jnp.where(pos < L, body, jnp.zeros_like(body))

    # Prepend the left causal halo (tail of the previous tile, or zeros).
    if use_carry:
        window = jnp.concatenate([carry_ref[...], body], axis=1)
    elif left_zeros > 0:
        window = jnp.concatenate(
            [jnp.zeros((c_in, left_zeros), in_dt), body], axis=1)
    else:
        window = body

    # In-kernel cast to the compute dtype (hidden under the tile DMA).
    window = window.astype(cdt)
    w_all = w_ref[...]                                  # (C_out, K*C_in)

    if use_im2col and K > 1:
        # im2col: stack K shifted views along channels -> one MXU matmul.
        taps = jnp.concatenate(
            [window[:, k * dilation:k * dilation + TL] for k in range(K)],
            axis=0)                                     # (K*C_in, TL)
        acc = jnp.dot(w_all, taps, preferred_element_type=jnp.float32)
    else:
        # K accumulating dots (contraction = C_in); no extra tile copies.
        acc = jnp.dot(w_all[:, :c_in], window[:, :TL],
                      preferred_element_type=jnp.float32)
        for k in range(1, K):
            acc = acc + jnp.dot(
                w_all[:, k * c_in:(k + 1) * c_in],
                window[:, k * dilation:k * dilation + TL],
                preferred_element_type=jnp.float32)

    acc = acc + b_ref[...]                              # f32 epilogue
    o_ref[0] = acc.astype(o_ref.dtype)

    if use_carry:
        # Carry this tile's tail to the next L tile (left causal halo).
        tlx = x_cur.shape[1]
        carry_ref[...] = x_cur[:, tlx - P:]


def _pick_tile_l(c_in, c_out, K, P, rh, vmem_cap, in_item, cdt_item, out_item):
    """Choose an L tile length from VMEM capacity (multiple of 128, <=8192)."""
    # Generation-aware budget: ~20 MiB on 128 MiB parts (v5e/v6e), ~10 MiB on
    # 64 MiB parts (v7x) — leaves headroom for double-buffering + im2col.
    budget = min(vmem_cap // 6, 20 * 1024 * 1024)
    bytes_per_l = (3 * c_in * in_item            # x double-buffer + window copy
                   + K * c_in * cdt_item         # im2col taps (worst case)
                   + c_out * 4                   # f32 accumulator
                   + 2 * c_out * out_item)       # output double-buffer
    tl = budget // max(bytes_per_l, 1)
    tl = (tl // 128) * 128
    tl = max(128, min(8192, tl))
    halo = max(P, rh)
    if halo > tl:
        tl = 128 * ((halo + 127) // 128)
    return int(tl)


def causal_conv1d(x_ncl, weight, bias, *, stride=1, padding=0, dilation=1,
                  tile_l=None, compute_dtype=None, im2col=None):
    """x_ncl: (B, C_in, L); weight: (C_out, C_in, K) [PyTorch conv1d layout]."""
    B, C_in, L = x_ncl.shape
    C_out, C_in_w, K = weight.shape
    assert C_in_w == C_in
    assert stride == 1  # TODO(synk): general stride needs strided windows

    P = 2 * padding * dilation                   # nn.Conv1d padding arg
    L_conv = (L + 2 * P - dilation * (K - 1) - 1) // stride + 1
    L_out = min(L, L_conv)                       # PyTorch slice [:, :, :L]
    assert L_out > 0
    rh = max(0, (K - 1) * dilation - P)          # right halo beyond tile end
    HALO = 128 * ((rh + 127) // 128) if rh > 0 else 0

    in_dt = x_ncl.dtype
    out_dtype = x_ncl.dtype
    cdt = jnp.dtype(compute_dtype) if compute_dtype is not None else jnp.dtype(in_dt)
    if im2col is None:
        im2col = C_in < 128

    # Weights/bias are tiny: reshape + cast in the wrapper. x stays untouched
    # in HBM; its cast to `cdt` happens in-kernel.
    # (C_out, C_in, K) -> (C_out, K*C_in); row order matches the tap stacking.
    w2 = jnp.transpose(weight, (0, 2, 1)).reshape(C_out, K * C_in).astype(cdt)
    b2 = bias.reshape(C_out, 1).astype(jnp.float32)

    try:
        vmem_cap = int(pltpu.get_tpu_info().vmem_capacity_bytes)
    except Exception:  # pragma: no cover — conservative fallback (v7x per-core)
        vmem_cap = 64 * 1024 * 1024
    vmem_limit = max(32 << 20, min(64 << 20, int(vmem_cap * 0.6)))

    if tile_l is None:
        tile_l = _pick_tile_l(C_in, C_out, K, P, rh, vmem_cap,
                              jnp.dtype(in_dt).itemsize, cdt.itemsize,
                              jnp.dtype(out_dtype).itemsize)
    if HALO:
        tile_l = ((int(tile_l) + HALO - 1) // HALO) * HALO  # halo-block aligned

    tiled = L_out > tile_l
    if tiled:
        TL = int(tile_l)
        assert TL % 128 == 0, "tile_l must be a multiple of 128"
        assert TL >= max(P, rh), "tile_l must cover the causal halo (>= max(P, rh))"
        NT = (L_out + TL - 1) // TL
        use_carry = P > 0
        use_next = rh > 0
        left_zeros = 0 if use_carry else P
        right_zeros = 0
        # Only configuration where a valid output can reach a position >= L.
        mask_tail = use_next and P > 0
        x_block = (1, C_in, TL)
    else:
        TL = L_out
        NT = 1
        use_carry = False
        use_next = False
        left_zeros = P
        right_zeros = max(0, L_out + rh - L)
        mask_tail = False
        x_block = (1, C_in, L)

    in_specs = [pl.BlockSpec(x_block, lambda b, i: (b, 0, i))]
    operands = [x_ncl]
    if use_next:
        step = TL // HALO
        nh_last = (L + HALO - 1) // HALO - 1
        in_specs.append(pl.BlockSpec(
            (1, C_in, HALO),
            lambda b, i: (b, 0, jnp.minimum((i + 1) * step, nh_last))))
        operands.append(x_ncl)
    in_specs += [
        pl.BlockSpec((C_out, K * C_in), lambda b, i: (0, 0)),
        pl.BlockSpec((C_out, 1), lambda b, i: (0, 0)),
    ]
    operands += [w2, b2]

    kernel = functools.partial(
        _causal_conv1d_kernel,
        K=K, dilation=dilation, P=P, TL=TL, L=L,
        use_carry=use_carry, use_next=use_next,
        left_zeros=left_zeros, right_zeros=right_zeros,
        mask_tail=mask_tail, use_im2col=im2col)

    in_item = jnp.dtype(in_dt).itemsize
    flops = 2 * B * L_out * K * C_in * C_out
    bytes_accessed = (B * C_in * L * in_item                       # x: read once
                      + (B * NT * C_in * HALO * in_item if use_next else 0)
                      + w2.size * w2.dtype.itemsize + b2.size * 4
                      + B * C_out * L_out * jnp.dtype(out_dtype).itemsize)

    l_sem = "arbitrary" if use_carry else "parallel"

    out = pl.pallas_call(
        kernel,
        out_shape=jax.ShapeDtypeStruct((B, C_out, L_out), out_dtype),
        grid=(B, NT),
        in_specs=in_specs,
        out_specs=pl.BlockSpec((1, C_out, TL), lambda b, i: (b, 0, i)),
        scratch_shapes=[pltpu.VMEM((C_in, max(P, 1)), in_dt)],
        compiler_params=pltpu.CompilerParams(
            dimension_semantics=("parallel", l_sem),
            vmem_limit_bytes=int(vmem_limit)),
        cost_estimate=pl.CostEstimate(flops=int(flops), transcendentals=0,
                                      bytes_accessed=int(bytes_accessed)),
    )(*operands)
    return out


def _reference(x_ncl, weight, bias, *, stride, padding, dilation):
    """Pure-JAX reference mirroring nn.Conv1d(padding=2*padding*dilation) + [:, :, :L]."""
    B, C_in, L = x_ncl.shape
    P = 2 * padding * dilation
    y = lax.conv_general_dilated(
        x_ncl, weight,
        window_strides=(stride,),
        padding=[(P, P)],
        rhs_dilation=(dilation,),
        dimension_numbers=("NCH", "OIH", "NCH"),
        precision=lax.Precision.HIGHEST,
    )
    y = y + bias.reshape(1, -1, 1)
    return y[:, :, :L]


if __name__ == "__main__":
    root = jax.random.PRNGKey(0)

    def run_case(case_id, *, B, C_in, C_out, L, K, padding, dilation,
                 tile_l=None, compute_dtype=None, atol=1e-4, rtol=1e-4):
        key = jax.random.fold_in(root, case_id)
        kx, kw, kb = jax.random.split(key, 3)
        x = jax.random.normal(kx, (B, C_in, L), dtype=jnp.float32)
        # PyTorch nn.Conv1d default init: U(-bound, bound), bound = 1/sqrt(C_in*K)
        bound = 1.0 / math.sqrt(C_in * K)
        w = jax.random.uniform(kw, (C_out, C_in, K), jnp.float32, -bound, bound)
        b = jax.random.uniform(kb, (C_out,), jnp.float32, -bound, bound)

        out = causal_conv1d(x, w, b, stride=1, padding=padding,
                            dilation=dilation, tile_l=tile_l,
                            compute_dtype=compute_dtype)
        out = jax.block_until_ready(out)
        ref = _reference(x, w, b, stride=1, padding=padding, dilation=dilation)
        assert out.shape == ref.shape, (case_id, out.shape, ref.shape)
        err = jnp.max(jnp.abs(out.astype(jnp.float32) - ref))
        assert jnp.allclose(out.astype(jnp.float32), ref, atol=atol, rtol=rtol), \
            f"case {case_id}: max abs err {err}"

    # 1) Small shapes from the module spec (single L tile, auto tile), f32.
    run_case(1, B=2, C_in=4, C_out=8, L=16, K=3, padding=1, dilation=1)
    # 2) Same config with bf16 MXU inputs (f32 accumulation) -> looser tol.
    run_case(2, B=2, C_in=4, C_out=8, L=16, K=3, padding=1, dilation=1,
             compute_dtype=jnp.bfloat16, atol=3e-2, rtol=3e-2)
    # 3) Tiled: left halo carried across L tiles, dilation=2, ragged tail,
    #    rh == 0 -> no boundary mask at all.
    run_case(3, B=2, C_in=4, C_out=8, L=640, K=3, padding=1, dilation=2,
             tile_l=256)
    # 4) Tiled with a right halo only (padding=0): small 128-lane halo block,
    #    both grid axes parallel, no mask.
    run_case(4, B=2, C_in=4, C_out=8, L=640, K=3, padding=0, dilation=1,
             tile_l=256)
    # 5) Tiled, carry + halo + tail mask (rh > 0 and P > 0), ragged last tile,
    #    clamped halo index on the final tile.
    run_case(5, B=2, C_in=4, C_out=8, L=400, K=5, padding=1, dilation=1,
             tile_l=256)
    # 6) Large C_in -> K accumulating dots path (no im2col), with carry.
    run_case(6, B=1, C_in=128, C_out=16, L=512, K=3, padding=1, dilation=1,
             tile_l=256, atol=1e-3, rtol=1e-3)

    print("KERNEL_OK")
</pallas_src>

<mosaic_0001>
module attributes {stable_mosaic.version = 11 : i64} {
  func.func @_causal_conv1d_kernel(%arg0: i32, %arg1: i32, %arg2: memref<1x4x16xf32, #tpu.memory_space<vmem>>, %arg3: memref<8x12xf32, #tpu.memory_space<vmem>>, %arg4: memref<8x1xf32, #tpu.memory_space<vmem>>, %arg5: memref<1x8x16xf32, #tpu.memory_space<vmem>>, %arg6: memref<4x2xf32, #tpu.memory_space<vmem>>) attributes {dimension_semantics = [#tpu.dimension_semantics<parallel>, #tpu.dimension_semantics<parallel>], iteration_bounds = array<i64: 2, 1>, scalar_prefetch = 0 : i64, scratch_operands = 1 : i64, tpu.core_type = #tpu.core_type<tc>, window_params = [{transform_indices = @transform_0, window_bounds = array<i64: 1, 4, 16>}, {pipeline_mode = #tpu.pipeline_mode<synchronous>, transform_indices = @transform_1, window_bounds = array<i64: 8, 12>}, {pipeline_mode = #tpu.pipeline_mode<synchronous>, transform_indices = @transform_2, window_bounds = array<i64: 8, 1>}, {transform_indices = @transform_3, window_bounds = array<i64: 1, 8, 16>}]} {
    %c0 = arith.constant 0 : index
    %c0_0 = arith.constant 0 : index
    %c0_1 = arith.constant 0 : index
    %0 = vector.load %arg2[%c0, %c0_0, %c0_1] : memref<1x4x16xf32, #tpu.memory_space<vmem>>, vector<1x4x16xf32>
    %1 = vector.shape_cast %0 : vector<1x4x16xf32> to vector<4x16xf32>
    %cst = arith.constant 0.000000e+00 : f32
    %2 = vector.broadcast %cst : f32 to vector<4x2xf32>
    %3 = tpu.concatenate %2, %1 in 1 : vector<4x2xf32>, vector<4x16xf32> -> vector<4x18xf32>
    %c0_2 = arith.constant 0 : index
    %c0_3 = arith.constant 0 : index
    %4 = vector.load %arg3[%c0_2, %c0_3] : memref<8x12xf32, #tpu.memory_space<vmem>>, vector<8x12xf32>
    %5 = vector.extract_strided_slice %3 {offsets = [0, 0], sizes = [4, 16], strides = [1, 1]} : vector<4x18xf32> to vector<4x16xf32>
    %6 = vector.extract_strided_slice %3 {offsets = [0, 1], sizes = [4, 16], strides = [1, 1]} : vector<4x18xf32> to vector<4x16xf32>
    %7 = vector.extract_strided_slice %3 {offsets = [0, 2], sizes = [4, 16], strides = [1, 1]} : vector<4x18xf32> to vector<4x16xf32>
    %8 = tpu.concatenate %5, %6, %7 in 0 : vector<4x16xf32>, vector<4x16xf32>, vector<4x16xf32> -> vector<12x16xf32>
    %cst_4 = arith.constant dense<0.000000e+00> : vector<8x16xf32>
    %9 = tpu.matmul %4, %8, %cst_4 {dimension_numbers = #tpu.dot_dimension_numbers<[1], [0], [0], [1], [0, 0, 1, 1], [], []>} : vector<8x12xf32>, vector<12x16xf32>, vector<8x16xf32> -> vector<8x16xf32>
    %c0_5 = arith.constant 0 : index
    %c0_6 = arith.constant 0 : index
    %10 = vector.load %arg4[%c0_5, %c0_6] : memref<8x1xf32, #tpu.memory_space<vmem>>, vector<8x1xf32>
    %11 = vector.broadcast %10 : vector<8x1xf32> to vector<8x16xf32>
    %12 = arith.addf %9, %11 : vector<8x16xf32>
    %c0_7 = arith.constant 0 : index
    %c0_8 = arith.constant 0 : index
    %c0_9 = arith.constant 0 : index
    %13 = vector.load %arg5[%c0_7, %c0_8, %c0_9] : memref<1x8x16xf32, #tpu.memory_space<vmem>>, vector<1x8x16xf32>
    %14 = vector.shape_cast %13 : vector<1x8x16xf32> to vector<8x16xf32>
    %15 = vector.shape_cast %12 : vector<8x16xf32> to vector<1x8x16xf32>
    tpu.vector_store %arg5[%c0_7, %c0_8, %c0_9], %15 {strides = array<i32>} : memref<1x8x16xf32, #tpu.memory_space<vmem>>, vector<1x8x16xf32>,
    return
  }
  func.func @transform_0(%arg0: i32, %arg1: i32) -> (i32, i32, i32) {
    %c0_i32 = arith.constant 0 : i32
    %c0_i32_0 = arith.constant 0 : i32
    return %arg0, %c0_i32, %arg1 : i32, i32, i32
  }
  func.func @transform_1(%arg0: i32, %arg1: i32) -> (i32, i32) {
    %c0_i32 = arith.constant 0 : i32
    %c0_i32_0 = arith.constant 0 : i32
    %c0_i32_1 = arith.constant 0 : i32
    return %c0_i32, %c0_i32_0 : i32, i32
  }
  func.func @transform_2(%arg0: i32, %arg1: i32) -> (i32, i32) {
    %c0_i32 = arith.constant 0 : i32
    %c0_i32_0 = arith.constant 0 : i32
    %c0_i32_1 = arith.constant 0 : i32
    return %c0_i32, %c0_i32_0 : i32, i32
  }
  func.func @transform_3(%arg0: i32, %arg1: i32) -> (i32, i32, i32) {
    %c0_i32 = arith.constant 0 : i32
    %c0_i32_0 = arith.constant 0 : i32
    return %arg0, %c0_i32, %arg1 : i32, i32, i32
  }
}

</mosaic_0001>

<bundles_post_ra>
// kernel: tpu_custom_call.1
= control target key start
LH: loop header
LB: loop body
LE: loop exit
PB: predicated region body
PF: predicated region fallthrough
CT: control target
= control target key end

     0   :  { %8 = vsyncpa [#allocation4], 0  ;;  %s686_s0 = inlined_call_operand.vmem [shape: f32[2,4,16], index: 0, kind: input, shape index: {}]   ;;  %s687_s1 = inlined_call_operand.hbm [shape: f32[8,12], index: 1, kind: input, shape index: {}]   ;;  %s688_s2 = inlined_call_operand.vmem [shape: f32[8,1], index: 2, kind: input, shape index: {}]   ;;  %s689_s3 = inlined_call_operand.hbm [shape: f32[2,8,16], index: 3, kind: output, shape index: {}]  }
   0x1   :  { %9 = vsyncpa [#allocation5], 0 }
   0x2   :  { %11 = vsyncpa [#allocation5 + $0x1], 0  ;;  %s583_s12 = smov 0   ;;  %s585_s13 = smov 0  }
   0x3   :  { %s587_s14 = smov 0   ;;  %s589_s15 = smov 0  }
   0x4   :  { %s591_s16 = smov 0   ;;  %s593_s17 = smov 0  }
   0x5 LB: > { %s357_s18 = sadd.s32 4294967295, %s556_s17   ;;  %s358_s19 = sadd.s32 4294967294, %s556_s17   ;;  %s556_s17 = sphi %s593_s17, %s17_s17   ;;  %s552_s16 = sphi %s591_s16, %s696_s16   ;;  %s548_s15 = sphi %s589_s15, %s695_s15   ;;  %s544_s14 = sphi %s587_s14, %s694_s14   ;;  %s540_s13 = sphi %s585_s13, %s693_s13   ;;  %s536_s12 = sphi %s583_s12, %s692_s12  }
   0x6   : > { %s29_s20 = sadd.s32 1, %s552_s16  ;;  %s108_s21 = sadd.s32 1, %s544_s14 }
   0x7   : > { %p31_p0 = scmp.ge.s32.totalorder %s29_s20, 2  ;;  %p118_p1 = scmp.ne.s32.totalorder %s544_s14, %s540_s13 }
   0x8   : > { %p119_p2 = scmp.eq.s32.totalorder %s357_s18, 1  ;;  %p124_p3 = scmp.ne.s32.totalorder %s540_s13, %s536_s12 }
   0x9   : > { %s698_s20 = smov (%p31_p0, %s29_s20), 0  ;;  %p125_p5 = scmp.eq.s32.totalorder %s358_s19, 1 }
   0xa   : > { %p623_p4 = por %p119_p2, %p118_p1  ;;  %s103_s23 = ssub.s32 %s552_s16, %s698_s20 }
   0xb   : > { %p359_p6 = scmp.ge.s32.totalorder %s556_s17, 1  ;;  %p106_p7 = scmp.eq.s32.totalorder %s103_s23, 0 }
   0xc   : > { %p630_p8 = por %p125_p5, %p124_p3  ;;  %p132_p9 = scmp.lt.s32.totalorder %s556_s17, 3 }
   0xd   : > { %s636_s25 = scalar_select %p106_p7, %s544_s14, %s108_s21  }
   0xe   : > { %p133_p10 = pnand %p359_p6, %p132_p9  ;;  %p386_p11 = scmp.eq.s32.totalorder %s357_s18, 0 }
   0xf   : > { %s144_s28 = sshll.u32 %s687_s1, 4  ;;  %s558_s29 = smov [#allocation3]   ;;  %s145_s28 = int_to_ptr.hbm [resolvable:$true] %s144_s28 }
  0x10   : > { %p378_p12 = pneg %p133_p10  ;;  %s146_s30 = sshll.u32 %s558_s29, 4  ;;  %s147_s30 = int_to_ptr.vmem [resolvable:$true] %s146_s30 }
  0x11   : > { %172 = sbr.rel (%p133_p10) target bundleno = 396 (0x18c), region = 32 }
  0x12   : > { %p379_p13 = pnand %p386_p11, %p378_p12 }
  0x14   : > { %381 = dma.hbm_to_vmem [thread:$0]  (!%p379_p13), %s145_s28, 128, %s147_s30, [#allocation4]  }
  0x16   : > { %527 = dma.done.wait (%p386_p11), [#allocation4], 128  }
  0x17   : > { %529 = vsyncadd (%p386_p11), [#allocation4], 4294967168  ;;  %p199_p0 = scmp.lt.s32.totalorder %s548_s15, 1  ;;  %s559_s9 = smov 2   ;;  %vm211_vm0 = vcmask 15360   ;;  %v223_v4 = vld [vmem:[%s688_s2] sm:$0xff] }
  0x18   : > { %s560_s10 = smov 126   ;;  %s561_s11 = smov 127   ;;  %v562_v5 = vmov 0   ;;  %vm221_vm1 = vcmask 1043456   ;;  %v213_v8 = vld [vmem:[#allocation3] sm:$0xff]  ;;  %vm229_vm2 = vcmask 97280  }
  0x19   : > { %s200_s4 = scalar_select %p199_p0, %s548_s15, 1  ;;  %442 = vset.pattern.permute.xlu1 %v562_v5  ;;  %443 = vset.pattern.permute.xlu0 %v562_v5  ;;  %vm255_vm3 = vcmask 130048  }
  0x1a   : > { %s196_s21 = sand.u32 1, %s540_s13   ;;  %s369_s26 = sshll.u32 %s548_s15, 3 }
  0x1b   : > { %s365_s5 = sshll.u32 %s200_s4, 2  ;;  %s364_s23 = sshll.u32 %s196_s21, 3 }
  0x1c   : > { %s205_s8 = scalar_lea.vmem %s686_s0, %s365_s5  ;;  %s269_s29 = scalar_lea.hbm %s689_s3, %s369_s26 }
  0x1d   : > { %v206_v0 = vld [vmem:[%s205_s8] sm:$0xf]  ;;  %s198_s30 = scalar_lea.vmem [#allocation6], %s364_s23  ;;  %s273_s5 = sshll.u32 %s269_s29, 4  ;;  %s274_s5 = int_to_ptr.hbm [resolvable:$true] %s273_s5 }
  0x1e   : > { %208 = vrot.lane.b32.xlu0 %v206_v0, %s559_s9  ;;  %s271_s4 = sshll.u32 %s198_s30, 4  ;;  %s258_s6 = scalar_lea.sflag [#allocation5], %s196_s21  ;;  %s272_s4 = int_to_ptr.vmem [resolvable:$true] %s271_s4 }
  0x1f   : > { %s488_s7 = sshra.s32 %s274_s5, 4  ;;  %s489_s7 = int_to_ptr.hbm [resolvable:$true] %s488_s7 }
  0x20   : > { %s490_s8 = scalar_lea.hbm %s489_s7, 8  ;;  %p495_p5 = scmp.lt.s32.totalorder %s489_s7, %s689_s3 }
  0x21   : > { %p491_p1 = scmp.ne.s32.totalorder %s489_s7, %s490_s8 }
  0x23   : > { %p492_p2 = pnand %p491_p1, %p623_p4 }
  0x25   : > { %p493_p3 = pneg %p492_p2 }
  0x90   : > { %v209_v1 = vpop.permute.xlu0 %208 }
  0x91   : > { %v212_v2 = vsel %vm211_vm0, 0.0, %v209_v1 }
  0x92   : > { %219 = vrot.lane.b32.xlu0 %v212_v2, %s560_s10  ;;  %v215_v3 = vrot.slane %v212_v2, 4  ;;  %s494_s10 = scalar_lea.hbm %s689_s3, 16 }
  0x93   : > { %p496_p6 = scmp.lt.s32.totalorder %s494_s10, %s490_s8 }
  0x94   : > { %216 = vrot.lane.b32.xlu1 %v215_v3, %s561_s11 }
  0x95   : > { %p497_p7 = por %p496_p6, %p495_p5 }
  0x97   : > { %p498_p9 = pnand %p497_p7, %p493_p3 }
  0x9c   : > { %226 = vperm.xlu1 %442, %v223_v4  }
 0x104   : > { %v220_v6 = vpop.permute.xlu0 %219 }
 0x105   : > { %366 = vmatpush.msk.msra.mxu0 %vm221_vm1, %v220_v6 }
 0x106   : > { %v217_v7 = vpop.permute.xlu1 %216 }
 0x107   : > { %v222_v9 = vsel %vm221_vm1, %v212_v2, %v217_v7 }
 0x108   : > { %250 = vmatpush.msra.mxu0 %v222_v9 }
 0x109   : > { %367 = vmatmul.msk.f32.vlgmr.msra.gmra.mxu0 %vm229_vm2, %v213_v8 }
 0x10e   : > { %v227_v10 = vpop.permute.xlu1 %226 }
 0x186   : > { %v252_v11 = vpop.f32.mrf.mxu0 }
 0x187   : > { %v253_v12 = vadd.f32 %v252_v11, %v227_v10 }
 0x189   : > { %256 = vst.msk [vmem:[%s198_s30] sm:$0xff] %vm255_vm3, %v253_v12 }
 0x18a   : > { %501 = shalt.err (!%p498_p9)
}
 0x18b   : > { %376 = dma.vmem_to_hbm [thread:$0]  (%p623_p4), %s272_s4, 128, %s274_s5, %s258_s6  }
 0x18c PF: > { %p388_p10 = scmp.ge.s32.totalorder %s556_s17, 2  ;;  %s285_s19 = sand.u32 1, %s536_s12  }
 0x18d   : > { %s286_s21 = scalar_lea.sflag [#allocation5], %s285_s19 }
 0x18e   : > { %p383_p11 = pnand %p388_p10, %p630_p8 }
 0x190   : > { %p384_p12 = pneg %p383_p11 }
 0x192   : > { %531 = dma.done.wait (%p384_p12), %s286_s21, 128  }
 0x193   : > { %533 = vsyncadd (%p384_p12), %s286_s21, 4294967168  ;;  %s17_s17 = sadd.s32 1, %s556_s17   ;;  %s692_s12 = smov %s540_s13 }
 0x194   : > { %p14_p13 = scmp.ge.s32.totalorder %s17_s17, 4   ;;  %s693_s13 = smov %s544_s14 }
 0x195   : > { %s694_s14 = smov %s636_s25  ;;  %s695_s15 = smov %s552_s16 }
 0x196   : > { %s696_s16 = smov %s698_s20  ;;  %16 = sbr.rel (!%p14_p13) target bundleno = 5 (0x5), region = 72 }
 0x19b   :  { %292 = vsyncpa [#allocation4], 1 }
 0x19c   :  { %294 = vsyncpa [#allocation4 + $0x1], 1 }
 0x19d   :  { %295 = vsyncpa [#allocation5], 1 }
 0x19e   :  { %297 = vsyncpa [#allocation5 + $0x1], 1 }

</bundles_post_ra>
